<compile_context>
chip_gen: v5e
topology: v5e:2x2
jax: 0.10.0
libtpu: 0.0.40
codegen_flags: <defaults>
</compile_context>

<pallas_src>
import functools

import jax
import jax.numpy as jnp
import numpy as np
from jax.experimental import pallas as pl
from jax.experimental.pallas import tpu as pltpu


def _round_up(n: int, m: int) -> int:
    return ((n + m - 1) // m) * m


def _choose_ff_tile(F: int, target: int) -> int:
    """Largest lane-friendly (multiple-of-128) divisor of F that is <= target."""
    if F <= target:
        return F
    for cand in range(target, 127, -128):
        if F % cand == 0:
            return cand
    # No 128-multiple divisor <= target: fall back to the whole F (still correct).
    return F


def _ffn_kernel(x_ref, w1_ref, b1_ref, w2_ref, b2_ref, g_ref, beta_ref,
                o_ref, acc_ref, *, eps: float):
    # x_ref: (tm, D); w1_ref: (D, tf); b1_ref: (1, tf); w2_ref: (tf, D);
    # b2/g/beta: (1, D); o_ref: (tm, D); acc_ref: (tm, D) f32 scratch.
    f = pl.program_id(1)

    @pl.when(f == 0)
    def _init():
        acc_ref[...] = jnp.zeros_like(acc_ref)

    # h_f = relu(x @ W1[:, f] + b1[f])  -- MXU consumes native-dtype operands,
    # f32 accumulation via preferred_element_type (no explicit up-casts).
    h = jnp.dot(x_ref[...], w1_ref[...], preferred_element_type=jnp.float32)
    h = jnp.maximum(h + b1_ref[...].astype(jnp.float32), 0.0)

    # Partial second matmul for this F-chunk; cast h down to the weight dtype
    # so bf16 weights keep the fast MXU path.  Accumulate in f32.
    acc_ref[...] += jnp.dot(h.astype(w2_ref.dtype), w2_ref[...],
                            preferred_element_type=jnp.float32)

    @pl.when(f == pl.num_programs(1) - 1)
    def _finalize():
        # y = h @ W2 + b2 ; residual ; LayerNorm over the model dim (f32 math).
        y = acc_ref[...] + b2_ref[...].astype(jnp.float32)
        r = y + x_ref[...].astype(jnp.float32)
        mean = jnp.mean(r, axis=-1, keepdims=True)
        c = r - mean
        var = jnp.mean(c * c, axis=-1, keepdims=True)
        inv = jax.lax.rsqrt(var + jnp.float32(eps))
        out = c * inv * g_ref[...].astype(jnp.float32) \
            + beta_ref[...].astype(jnp.float32)
        o_ref[...] = out.astype(o_ref.dtype)


def positionwise_feed_forward(x, w1, b1, w2, b2, gamma, beta,
                              *, eps: float = 1e-5,
                              block_rows: int = 256, block_ff: int = 512):
    """Fused FFN + residual + LayerNorm.  x: (B, T, D) -> (B, T, D)."""
    B, T, D = x.shape
    F_ = w1.shape[1]
    M = B * T

    x2 = x.reshape(M, D)

    # Row tile: multiple of 8 (sublane rule), multiple of 256 preferred for the
    # v6e/v7x 256x256 MXU; never larger than block_rows.  Partial last block is
    # masked by Pallas (no host-side padding / slicing).
    tm = min(block_rows, _round_up(M, 8))
    # dim_ff chunk: keeps the live (tm, tf) intermediate small and streams
    # W1/W2 instead of holding them fully resident.
    tf = _choose_ff_tile(F_, block_ff)

    grid = (pl.cdiv(M, tm), pl.cdiv(F_, tf))

    # 2-D (1, N) shapes so biases / LN params sit on the lane axis.
    b1_2 = b1.reshape(1, F_)
    b2_2 = b2.reshape(1, D)
    g_2 = gamma.reshape(1, D)
    be_2 = beta.reshape(1, D)

    xbytes = x.dtype.itemsize
    wbytes = w1.dtype.itemsize

    # VMEM footprint: x + out blocks (double-buffered), streamed W1/W2 chunks
    # (double-buffered), small params, f32 accumulator, live h intermediate.
    vmem_est = (
        2 * 2 * tm * D * xbytes
        + 2 * 2 * tf * D * wbytes
        + 2 * (tf + 3 * D) * wbytes
        + tm * D * 4
        + tm * tf * 4
    )
    # Generous headroom, clamped to a v7x-safe ceiling (64 MiB physical).
    vmem_limit = int(min(max(int(vmem_est * 1.5) + (2 << 20), 32 << 20),
                         56 << 20))

    cost = pl.CostEstimate(
        flops=4 * M * D * F_ + 10 * M * D,
        transcendentals=M,                       # one rsqrt per row
        bytes_accessed=2 * M * D * xbytes + 2 * D * F_ * wbytes
                       + (F_ + 3 * D) * wbytes,
    )

    out2 = pl.pallas_call(
        functools.partial(_ffn_kernel, eps=eps),
        out_shape=jax.ShapeDtypeStruct((M, D), x.dtype),
        grid_spec=pltpu.PrefetchScalarGridSpec(
            num_scalar_prefetch=0,
            grid=grid,
            in_specs=[
                pl.BlockSpec((tm, D), lambda i, f: (i, 0)),   # x row slab (resident over f)
                pl.BlockSpec((D, tf), lambda i, f: (0, f)),   # W1 F-chunk (streamed)
                pl.BlockSpec((1, tf), lambda i, f: (0, f)),   # b1 F-chunk
                pl.BlockSpec((tf, D), lambda i, f: (f, 0)),   # W2 F-chunk (streamed)
                pl.BlockSpec((1, D), lambda i, f: (0, 0)),    # b2
                pl.BlockSpec((1, D), lambda i, f: (0, 0)),    # gamma
                pl.BlockSpec((1, D), lambda i, f: (0, 0)),    # beta
            ],
            out_specs=pl.BlockSpec((tm, D), lambda i, f: (i, 0)),
            scratch_shapes=[pltpu.VMEM((tm, D), jnp.float32)],  # f32 accumulator
        ),
        compiler_params=pltpu.CompilerParams(
            dimension_semantics=("parallel", "arbitrary"),
            vmem_limit_bytes=vmem_limit,
        ),
        cost_estimate=cost,
    )(x2, w1, b1_2, w2, b2_2, g_2, be_2)

    return out2.reshape(B, T, D)


def _reference_ffn(x, w1, b1, w2, b2, gamma, beta, eps=1e-5):
    """NumPy port of the PyTorch module in eval mode."""
    x = np.asarray(x, np.float32)
    h = np.maximum(x @ np.asarray(w1) + np.asarray(b1), 0.0)
    y = h @ np.asarray(w2) + np.asarray(b2)
    r = y + x
    mean = r.mean(-1, keepdims=True)
    var = r.var(-1, keepdims=True)  # biased, matching nn.LayerNorm
    return (r - mean) / np.sqrt(var + eps) * np.asarray(gamma) + np.asarray(beta)


if __name__ == "__main__":
    B, T, dim_model, dim_ff = 2, 8, 32, 64

    key = jax.random.PRNGKey(0)
    kx, k1, k2, k3, k4, k5, k6 = jax.random.split(key, 7)

    x = jax.random.normal(kx, (B, T, dim_model), dtype=jnp.float32)
    w1 = jax.random.normal(k1, (dim_model, dim_ff), dtype=jnp.float32) * 0.1
    b1 = jax.random.normal(k2, (dim_ff,), dtype=jnp.float32) * 0.1
    w2 = jax.random.normal(k3, (dim_ff, dim_model), dtype=jnp.float32) * 0.1
    b2 = jax.random.normal(k4, (dim_model,), dtype=jnp.float32) * 0.1
    gamma = jnp.ones((dim_model,), dtype=jnp.float32) + 0.1 * jax.random.normal(
        k5, (dim_model,), dtype=jnp.float32)
    beta = 0.1 * jax.random.normal(k6, (dim_model,), dtype=jnp.float32)

    out = positionwise_feed_forward(x, w1, b1, w2, b2, gamma, beta)
    out = jax.block_until_ready(out)

    ref = _reference_ffn(np.asarray(x), np.asarray(w1), np.asarray(b1),
                         np.asarray(w2), np.asarray(b2),
                         np.asarray(gamma), np.asarray(beta))

    assert out.shape == (B, T, dim_model), out.shape
    np.testing.assert_allclose(np.asarray(out), ref, rtol=1e-4, atol=1e-4)

    print("KERNEL_OK")
</pallas_src>

<mosaic_0001>
module attributes {stable_mosaic.version = 11 : i64} {
  func.func @_ffn_kernel(%arg0: i32, %arg1: i32, %arg2: memref<16x32xf32, #tpu.memory_space<vmem>>, %arg3: memref<32x64xf32, #tpu.memory_space<vmem>>, %arg4: memref<1x64xf32, #tpu.memory_space<vmem>>, %arg5: memref<64x32xf32, #tpu.memory_space<vmem>>, %arg6: memref<1x32xf32, #tpu.memory_space<vmem>>, %arg7: memref<1x32xf32, #tpu.memory_space<vmem>>, %arg8: memref<1x32xf32, #tpu.memory_space<vmem>>, %arg9: memref<16x32xf32, #tpu.memory_space<vmem>>, %arg10: memref<16x32xf32, #tpu.memory_space<vmem>>) attributes {dimension_semantics = [#tpu.dimension_semantics<parallel>, #tpu.dimension_semantics<arbitrary>], iteration_bounds = array<i64: 1, 1>, scalar_prefetch = 0 : i64, scratch_operands = 1 : i64, tpu.core_type = #tpu.core_type<tc>, window_params = [{transform_indices = @transform_0, window_bounds = array<i64: 16, 32>}, {transform_indices = @transform_1, window_bounds = array<i64: 32, 64>}, {transform_indices = @transform_2, window_bounds = array<i64: 1, 64>}, {transform_indices = @transform_3, window_bounds = array<i64: 64, 32>}, {pipeline_mode = #tpu.pipeline_mode<synchronous>, transform_indices = @transform_4, window_bounds = array<i64: 1, 32>}, {pipeline_mode = #tpu.pipeline_mode<synchronous>, transform_indices = @transform_5, window_bounds = array<i64: 1, 32>}, {pipeline_mode = #tpu.pipeline_mode<synchronous>, transform_indices = @transform_6, window_bounds = array<i64: 1, 32>}, {transform_indices = @transform_7, window_bounds = array<i64: 16, 32>}]} {
    %c0_i32 = arith.constant 0 : i32
    %0 = arith.cmpi eq, %arg1, %c0_i32 : i32
    %1 = arith.extui %0 : i1 to i32
    %c0_i32_0 = arith.constant 0 : i32
    %2 = arith.cmpi ne, %1, %c0_i32_0 : i32
    scf.if %2 {
      %cst_16 = arith.constant 0.000000e+00 : f32
      %19 = vector.broadcast %cst_16 : f32 to vector<16x32xf32>
      %c0_17 = arith.constant 0 : index
      %c0_18 = arith.constant 0 : index
      %20 = vector.load %arg10[%c0_17, %c0_18] : memref<16x32xf32, #tpu.memory_space<vmem>>, vector<16x32xf32>
      tpu.vector_store %arg10[%c0_17, %c0_18], %19 {strides = array<i32>} : memref<16x32xf32, #tpu.memory_space<vmem>>, vector<16x32xf32>,
    } else {
    }
    %c0 = arith.constant 0 : index
    %c0_1 = arith.constant 0 : index
    %3 = vector.load %arg2[%c0, %c0_1] : memref<16x32xf32, #tpu.memory_space<vmem>>, vector<16x32xf32>
    %c0_2 = arith.constant 0 : index
    %c0_3 = arith.constant 0 : index
    %4 = vector.load %arg3[%c0_2, %c0_3] : memref<32x64xf32, #tpu.memory_space<vmem>>, vector<32x64xf32>
    %cst = arith.constant dense<0.000000e+00> : vector<16x64xf32>
    %5 = tpu.matmul %3, %4, %cst {dimension_numbers = #tpu.dot_dimension_numbers<[1], [0], [0], [1], [0, 0, 1, 1], [], []>} : vector<16x32xf32>, vector<32x64xf32>, vector<16x64xf32> -> vector<16x64xf32>
    %c0_4 = arith.constant 0 : index
    %c0_5 = arith.constant 0 : index
    %6 = vector.load %arg4[%c0_4, %c0_5] : memref<1x64xf32, #tpu.memory_space<vmem>>, vector<1x64xf32>
    %7 = vector.broadcast %6 : vector<1x64xf32> to vector<16x64xf32>
    %8 = arith.addf %5, %7 : vector<16x64xf32>
    %cst_6 = arith.constant 0.000000e+00 : f32
    %9 = vector.broadcast %cst_6 : f32 to vector<16x64xf32>
    %10 = arith.maximumf %8, %9 : vector<16x64xf32>
    %c0_7 = arith.constant 0 : index
    %c0_8 = arith.constant 0 : index
    %11 = vector.load %arg10[%c0_7, %c0_8] : memref<16x32xf32, #tpu.memory_space<vmem>>, vector<16x32xf32>
    %c0_9 = arith.constant 0 : index
    %c0_10 = arith.constant 0 : index
    %12 = vector.load %arg5[%c0_9, %c0_10] : memref<64x32xf32, #tpu.memory_space<vmem>>, vector<64x32xf32>
    %cst_11 = arith.constant dense<0.000000e+00> : vector<16x32xf32>
    %13 = tpu.matmul %10, %12, %cst_11 {dimension_numbers = #tpu.dot_dimension_numbers<[1], [0], [0], [1], [0, 0, 1, 1], [], []>} : vector<16x64xf32>, vector<64x32xf32>, vector<16x32xf32> -> vector<16x32xf32>
    %14 = arith.addf %11, %13 : vector<16x32xf32>
    %c0_12 = arith.constant 0 : index
    %c0_13 = arith.constant 0 : index
    %15 = vector.load %arg10[%c0_12, %c0_13] : memref<16x32xf32, #tpu.memory_space<vmem>>, vector<16x32xf32>
    tpu.vector_store %arg10[%c0_12, %c0_13], %14 {strides = array<i32>} : memref<16x32xf32, #tpu.memory_space<vmem>>, vector<16x32xf32>,
    %c0_i32_14 = arith.constant 0 : i32
    %16 = arith.cmpi eq, %arg1, %c0_i32_14 : i32
    %17 = arith.extui %16 : i1 to i32
    %c0_i32_15 = arith.constant 0 : i32
    %18 = arith.cmpi ne, %17, %c0_i32_15 : i32
    scf.if %18 {
      %c0_16 = arith.constant 0 : index
      %c0_17 = arith.constant 0 : index
      %19 = vector.load %arg10[%c0_16, %c0_17] : memref<16x32xf32, #tpu.memory_space<vmem>>, vector<16x32xf32>
      %c0_18 = arith.constant 0 : index
      %c0_19 = arith.constant 0 : index
      %20 = vector.load %arg6[%c0_18, %c0_19] : memref<1x32xf32, #tpu.memory_space<vmem>>, vector<1x32xf32>
      %21 = vector.broadcast %20 : vector<1x32xf32> to vector<16x32xf32>
      %22 = arith.addf %19, %21 : vector<16x32xf32>
      %c0_20 = arith.constant 0 : index
      %c0_21 = arith.constant 0 : index
      %23 = vector.load %arg2[%c0_20, %c0_21] : memref<16x32xf32, #tpu.memory_space<vmem>>, vector<16x32xf32>
      %24 = arith.addf %22, %23 : vector<16x32xf32>
      %cst_22 = arith.constant dense<0.000000e+00> : vector<16xf32>
      %25 = vector.multi_reduction <add>, %24, %cst_22 [1] : vector<16x32xf32> to vector<16xf32>
      %26 = vector.shape_cast %25 : vector<16xf32> to vector<16x1xf32>
      %cst_23 = arith.constant 3.200000e+01 : f32
      %27 = vector.broadcast %cst_23 : f32 to vector<16x1xf32>
      %28 = arith.divf %26, %27 : vector<16x1xf32>
      %29 = vector.broadcast %28 : vector<16x1xf32> to vector<16x32xf32>
      %30 = arith.subf %24, %29 : vector<16x32xf32>
      %31 = arith.mulf %30, %30 : vector<16x32xf32>
      %cst_24 = arith.constant dense<0.000000e+00> : vector<16xf32>
      %32 = vector.multi_reduction <add>, %31, %cst_24 [1] : vector<16x32xf32> to vector<16xf32>
      %33 = vector.shape_cast %32 : vector<16xf32> to vector<16x1xf32>
      %cst_25 = arith.constant 3.200000e+01 : f32
      %34 = vector.broadcast %cst_25 : f32 to vector<16x1xf32>
      %35 = arith.divf %33, %34 : vector<16x1xf32>
      %cst_26 = arith.constant 9.99999974E-6 : f32
      %36 = vector.broadcast %cst_26 : f32 to vector<16x1xf32>
      %37 = arith.addf %35, %36 : vector<16x1xf32>
      %38 = math.rsqrt %37 : vector<16x1xf32>
      %39 = vector.broadcast %38 : vector<16x1xf32> to vector<16x32xf32>
      %40 = arith.mulf %30, %39 : vector<16x32xf32>
      %c0_27 = arith.constant 0 : index
      %c0_28 = arith.constant 0 : index
      %41 = vector.load %arg7[%c0_27, %c0_28] : memref<1x32xf32, #tpu.memory_space<vmem>>, vector<1x32xf32>
      %42 = vector.broadcast %41 : vector<1x32xf32> to vector<16x32xf32>
      %43 = arith.mulf %40, %42 : vector<16x32xf32>
      %c0_29 = arith.constant 0 : index
      %c0_30 = arith.constant 0 : index
      %44 = vector.load %arg8[%c0_29, %c0_30] : memref<1x32xf32, #tpu.memory_space<vmem>>, vector<1x32xf32>
      %45 = vector.broadcast %44 : vector<1x32xf32> to vector<16x32xf32>
      %46 = arith.addf %43, %45 : vector<16x32xf32>
      %c0_31 = arith.constant 0 : index
      %c0_32 = arith.constant 0 : index
      %47 = vector.load %arg9[%c0_31, %c0_32] : memref<16x32xf32, #tpu.memory_space<vmem>>, vector<16x32xf32>
      tpu.vector_store %arg9[%c0_31, %c0_32], %46 {strides = array<i32>} : memref<16x32xf32, #tpu.memory_space<vmem>>, vector<16x32xf32>,
    } else {
    }
    return
  }
  func.func @transform_0(%arg0: i32, %arg1: i32) -> (i32, i32) {
    %c0_i32 = arith.constant 0 : i32
    %c0_i32_0 = arith.constant 0 : i32
    return %arg0, %c0_i32 : i32, i32
  }
  func.func @transform_1(%arg0: i32, %arg1: i32) -> (i32, i32) {
    %c0_i32 = arith.constant 0 : i32
    %c0_i32_0 = arith.constant 0 : i32
    return %c0_i32, %arg1 : i32, i32
  }
  func.func @transform_2(%arg0: i32, %arg1: i32) -> (i32, i32) {
    %c0_i32 = arith.constant 0 : i32
    %c0_i32_0 = arith.constant 0 : i32
    return %c0_i32, %arg1 : i32, i32
  }
  func.func @transform_3(%arg0: i32, %arg1: i32) -> (i32, i32) {
    %c0_i32 = arith.constant 0 : i32
    %c0_i32_0 = arith.constant 0 : i32
    return %arg1, %c0_i32 : i32, i32
  }
  func.func @transform_4(%arg0: i32, %arg1: i32) -> (i32, i32) {
    %c0_i32 = arith.constant 0 : i32
    %c0_i32_0 = arith.constant 0 : i32
    %c0_i32_1 = arith.constant 0 : i32
    return %c0_i32, %c0_i32_0 : i32, i32
  }
  func.func @transform_5(%arg0: i32, %arg1: i32) -> (i32, i32) {
    %c0_i32 = arith.constant 0 : i32
    %c0_i32_0 = arith.constant 0 : i32
    %c0_i32_1 = arith.constant 0 : i32
    return %c0_i32, %c0_i32_0 : i32, i32
  }
  func.func @transform_6(%arg0: i32, %arg1: i32) -> (i32, i32) {
    %c0_i32 = arith.constant 0 : i32
    %c0_i32_0 = arith.constant 0 : i32
    %c0_i32_1 = arith.constant 0 : i32
    return %c0_i32, %c0_i32_0 : i32, i32
  }
  func.func @transform_7(%arg0: i32, %arg1: i32) -> (i32, i32) {
    %c0_i32 = arith.constant 0 : i32
    %c0_i32_0 = arith.constant 0 : i32
    return %arg0, %c0_i32 : i32, i32
  }
}

</mosaic_0001>

<bundles_post_ra>
// kernel: tpu_custom_call.1
= control target key start
LH: loop header
LB: loop body
LE: loop exit
PB: predicated region body
PF: predicated region fallthrough
CT: control target
= control target key end

     0   :  { %vm31_vm0 = vcmask 261120   ;;  %s389_s0 = inlined_call_operand.vmem [shape: f32[16,32], index: 0, kind: input, shape index: {}]   ;;  %s390_s1 = inlined_call_operand.vmem [shape: f32[32,64], index: 1, kind: input, shape index: {}]   ;;  %s391_s2 = inlined_call_operand.vmem [shape: f32[1,64], index: 2, kind: input, shape index: {}]   ;;  %s392_s3 = inlined_call_operand.vmem [shape: f32[64,32], index: 3, kind: input, shape index: {}]   ;;  %s393_s4 = inlined_call_operand.vmem [shape: f32[1,32], index: 4, kind: input, shape index: {}]   ;;  %s394_s5 = inlined_call_operand.vmem [shape: f32[1,32], index: 5, kind: input, shape index: {}]   ;;  %s395_s6 = inlined_call_operand.vmem [shape: f32[1,32], index: 6, kind: input, shape index: {}]   ;;  %s396_s7 = inlined_call_operand.hbm [shape: f32[16,32], index: 7, kind: output, shape index: {}]  }
   0x1   :  { %v39_v0 = vld [vmem:[%s390_s1 + $0x18] sm:$0xff]  ;;  %v38_v1 = vld [vmem:[%s390_s1 + $0x10] sm:$0xff]  ;;  %v37_v2 = vld [vmem:[%s390_s1 + $0x8] sm:$0xff] }
   0x2   :  { %63 = vmatpush.msra.mxu0 %v39_v0  ;;  %222 = vmatpush.msra.mxu3 %v39_v0  ;;  %v85_v3 = vld [vmem:[%s392_s3 + $0x38] sm:$0xff]  ;;  %v36_v4 = vld [vmem:[%s390_s1] sm:$0xff]  ;;  %v84_v5 = vld [vmem:[%s392_s3 + $0x30] sm:$0xff] }
   0x3   :  { %v34_v6 = vld [vmem:[%s389_s0] sm:$0xff]  ;;  %101 = vmatpush.msra.mxu1 %v85_v3  ;;  %226 = vmatpush.msra.mxu2 %v85_v3  ;;  %v35_v7 = vld [vmem:[%s389_s0 + $0x8] sm:$0xff] }
   0x4   :  { %64 = vmatpush.msra.mxu0 %v38_v1  ;;  %223 = vmatpush.msra.mxu3 %v38_v1 }
   0x6   :  { %65 = vmatpush.msra.mxu0 %v37_v2  ;;  %224 = vmatpush.msra.mxu3 %v37_v2 }
   0x7   :  { %12 = vsyncpa [#allocation4], 0  ;;  %102 = vmatpush.msra.mxu1 %v84_v5  ;;  %v83_v8 = vld [vmem:[%s392_s3 + $0x28] sm:$0xff]  ;;  %227 = vmatpush.msra.mxu2 %v84_v5  ;;  %v82_v9 = vld [vmem:[%s392_s3 + $0x20] sm:$0xff]  ;;  %v275_v14 = vmov 0.0   ;;  %vm86_vm1 = vcmask 523264  }
   0x8   :  { %66 = vmatpush.msra.mxu0 %v36_v4  ;;  %225 = vmatpush.msra.mxu3 %v36_v4  ;;  %v81_v10 = vld [vmem:[%s392_s3 + $0x18] sm:$0xff]  ;;  %v80_v11 = vld [vmem:[%s392_s3 + $0x10] sm:$0xff]  ;;  %v79_v12 = vld [vmem:[%s392_s3 + $0x8] sm:$0xff]  ;;  %32 = vst.msk [vmem:[#allocation2] sm:$0xff] %vm31_vm0, %v275_v14  ;;  %v276_v37 = vmov 32.0   ;;  %s278_s12 = smov 128  }
   0x9   :  { %218 = vmatmul.msk.f32.vlgmr.msra.gmra.mxu0 %vm31_vm0, %v34_v6  ;;  %219 = vmatmul.msk.f32.vlgmr.msra.gmra.mxu3 %vm31_vm0, %v35_v7  ;;  %v78_v13 = vld [vmem:[%s392_s3] sm:$0xff]  ;;  %33 = vst.msk [vmem:[#allocation2 + $0x8] sm:$0xff] %vm31_vm0, %v275_v14  ;;  %243 = vrcp.f32 %v276_v37  ;;  %s279_s13 = smov 8  }
   0xa   :  { %103 = vmatpush.msra.mxu1 %v83_v8  ;;  %228 = vmatpush.msra.mxu2 %v83_v8  ;;  %v239_v15 = vld [vmem:[%s391_s2] ss:$0 sm:$0xff] }
   0xb   :  { %v240_v25 = vld [vmem:[%s393_s4] ss:$0 sm:$0xff] }
   0xc   :  { %104 = vmatpush.msra.mxu1 %v82_v9  ;;  %229 = vmatpush.msra.mxu2 %v82_v9  ;;  %v241_v2 = vld [vmem:[%s394_s5] ss:$0 sm:$0xff]  ;;  %s277_s5 = smov [#allocation3]  }
   0xd   :  { %s204_s9 = sshll.u32 %s277_s5, 4  ;;  %s205_s9 = int_to_ptr.vmem [resolvable:$true] %s204_s9 }
   0xe   :  { %105 = vmatpush.msra.mxu1 %v81_v10  ;;  %230 = vmatpush.msra.mxu2 %v81_v10 }
   0xf   :  { %v76_v22 = vld [vmem:[#allocation2] sm:$0xff]  ;;  %v244_v38 = vpop.eup %243 }
  0x10   :  { %106 = vmatpush.msra.mxu1 %v80_v11  ;;  %231 = vmatpush.msra.mxu2 %v80_v11  ;;  %v77_v26 = vld [vmem:[#allocation2 + $0x8] sm:$0xff]  ;;  %v142_v39 = vmul.f32 32.0, %v244_v38  ;;  %vm146_vm2 = vweird.f32 %v244_v38 }
  0x12   :  { %107 = vmatpush.msra.mxu1 %v79_v12  ;;  %232 = vmatpush.msra.mxu2 %v79_v12  ;;  %v143_v40 = vsub.f32 1.0, %v142_v39 }
  0x14   :  { %108 = vmatpush.msra.mxu1 %v78_v13  ;;  %233 = vmatpush.msra.mxu2 %v78_v13  ;;  %v144_v41 = vmul.f32 %v244_v38, %v143_v40 }
  0x16   :  { %v145_v42 = vadd.f32 %v244_v38, %v144_v41 }
  0x18   :  { %v147_v43 = vsel %vm146_vm2, %v244_v38, %v145_v42 }
  0x86   :  { %v68_v16 = vpop.f32.mrf.mxu0 }
  0x87   :  { %v69_v17 = vadd.f32 %v239_v15, %v68_v16 }
  0x89   :  { %v74_v18 = vmax.f32 %v69_v17, 0.0 }
  0x8b   :  { %220 = vmatmul.msk.f32.vlgmr.msra.gmra.mxu1 %vm86_vm1, %v74_v18 }
  0x8c   :  { %v71_v19 = vpop.f32.mrf.mxu3 }
  0x8d   :  { %v72_v20 = vadd.f32 %v239_v15, %v71_v19 }
  0x8f   :  { %v75_v21 = vmax.f32 %v72_v20, 0.0 }
  0x91   :  { %221 = vmatmul.msk.f32.vlgmr.msra.gmra.mxu2 %vm86_vm1, %v75_v21 }
 0x108   :  { %v110_v23 = vpop.f32.mrf.mxu1 }
 0x109   :  { %v116_v24 = vadd.f32 %v110_v23, %v76_v22 }
 0x10b   :  { %118 = vst.msk [vmem:[#allocation2] sm:$0xff] %vm31_vm0, %v116_v24 }
 0x112   :  { %v123_v27 = vld [vmem:[#allocation2] sm:$0xff] }
 0x113   :  { %v129_v28 = vadd.f32 %v240_v25, %v123_v27 }
 0x114   :  { %v113_v29 = vpop.f32.mrf.mxu2 }
 0x115   :  { %v117_v30 = vadd.f32 %v113_v29, %v77_v26  ;;  %v133_v31 = vadd.f32 %v129_v28, %v34_v6  ;;  %v242_v6 = vld [vmem:[%s395_s6] ss:$0 sm:$0xff]  ;;  %s206_s6 = sshll.u32 %s396_s7, 4  ;;  %s207_s6 = int_to_ptr.hbm [resolvable:$true] %s206_s6 }
 0x117   :  { %119 = vst.msk [vmem:[#allocation2 + $0x8] sm:$0xff] %vm31_vm0, %v117_v30  ;;  %v135_v32 = vsel %vm31_vm0, %v133_v31, 0.0 }
 0x118   :  { %136 = vadd.xlane.f32.xlu0 %v135_v32 }
 0x11e   :  { %v124_v33 = vld [vmem:[#allocation2 + $0x8] sm:$0xff] }
 0x11f   :  { %v130_v34 = vadd.f32 %v240_v25, %v124_v33 }
 0x121   :  { %v134_v35 = vadd.f32 %v130_v34, %v35_v7 }
 0x123   :  { %v138_v36 = vsel %vm31_vm0, %v134_v35, 0.0 }
 0x124   :  { %139 = vadd.xlane.f32.xlu0 %v138_v36 }
 0x18b   :  { %v137_v44 = vpop.xlane.xlu0 %136 }
 0x18c   :  { %v148_v45 = vmul.f32 %v147_v43, %v137_v44 }
 0x18e   :  { %v150_v46 = vsub.f32 %v133_v31, %v148_v45 }
 0x190   :  { %v152_v47 = vmul.f32 %v150_v46, %v150_v46 }
 0x192   :  { %v154_v48 = vsel %vm31_vm0, %v152_v47, 0.0 }
 0x193   :  { %155 = vadd.xlane.f32.xlu1 %v154_v48 }
 0x197   :  { %v140_v49 = vpop.xlane.xlu0 %139 }
 0x198   :  { %v149_v50 = vmul.f32 %v147_v43, %v140_v49 }
 0x19a   :  { %v151_v51 = vsub.f32 %v134_v35, %v149_v50 }
 0x19c   :  { %v153_v52 = vmul.f32 %v151_v51, %v151_v51 }
 0x19e   :  { %v157_v53 = vsel %vm31_vm0, %v153_v52, 0.0 }
 0x19f   :  { %158 = vadd.xlane.f32.xlu1 %v157_v53 }
 0x206   :  { %v156_v54 = vpop.xlane.xlu1 %155 }
 0x207   :  { %v160_v55 = vmul.f32 %v156_v54, %v147_v43 }
 0x209   :  { %v162_v56 = vadd.f32 1e-05, %v160_v55 }
 0x20b   :  { %245 = vrsqrt.f32 %v162_v56  ;;  %vm170_vm4 = vweird.f32 %v162_v56 }
 0x211   :  { %v246_v57 = vpop.eup %245 }
 0x212   :  { %v165_v58 = vmul.f32 %v246_v57, %v162_v56  ;;  %v159_v59 = vpop.xlane.xlu1 %158  ;;  %vm171_vm3 = vweird.f32 %v246_v57 }
 0x213   :  { %v161_v60 = vmul.f32 %v159_v59, %v147_v43  ;;  %vm172_vm5 = vmor %vm170_vm4, %vm171_vm3 }
 0x214   :  { %v166_v61 = vmul.f32 %v246_v57, %v165_v58 }
 0x215   :  { %v163_v62 = vadd.f32 1e-05, %v161_v60 }
 0x216   :  { %v167_v63 = vmul.f32 0.5, %v166_v61 }
 0x217   :  { %247 = vrsqrt.f32 %v163_v62  ;;  %vm180_vm7 = vweird.f32 %v163_v62 }
 0x218   :  { %v168_v0 = vsub.f32 1.5, %v167_v63 }
 0x21a   :  { %v169_v1 = vmul.f32 %v246_v57, %v168_v0 }
 0x21c   :  { %v173_v3 = vsel %vm172_vm5, %v246_v57, %v169_v1 }
 0x21d   :  { %v248_v4 = vpop.eup %247  ;;  %v184_v5 = vmul.f32 %v173_v3, %v150_v46 }
 0x21e   :  { %v175_v7 = vmul.f32 %v248_v4, %v163_v62  ;;  %vm181_vm6 = vweird.f32 %v248_v4 }
 0x21f   :  { %v190_v8 = vmul.f32 %v241_v2, %v184_v5  ;;  %vm182_vm8 = vmor %vm180_vm7, %vm181_vm6 }
 0x220   :  { %v176_v9 = vmul.f32 %v248_v4, %v175_v7 }
 0x221   :  { %v196_v10 = vadd.f32 %v242_v6, %v190_v8 }
 0x222   :  { %v177_v11 = vmul.f32 0.5, %v176_v9 }
 0x223   :  { %198 = vst.msk [vmem:[#allocation3] sm:$0xff] %vm31_vm0, %v196_v10 }
 0x224   :  { %v178_v12 = vsub.f32 1.5, %v177_v11 }
 0x226   :  { %v179_v13 = vmul.f32 %v248_v4, %v178_v12 }
 0x228   :  { %v183_v14 = vsel %vm182_vm8, %v248_v4, %v179_v13 }
 0x229   :  { %v185_v15 = vmul.f32 %v183_v14, %v151_v51 }
 0x22b   :  { %v191_v16 = vmul.f32 %v241_v2, %v185_v15 }
 0x22d   :  { %v197_v17 = vadd.f32 %v242_v6, %v191_v16 }
 0x22f   :  { %199 = vst.msk [vmem:[#allocation3 + $0x8] sm:$0xff] %vm31_vm0, %v197_v17 }
 0x230   :  { %212 = dma.vmem_to_hbm [thread:$0]  %s205_s9, 256, %s207_s6, [#allocation4], %s278_s12, %s278_s12, %s279_s13  }
 0x231   :  { %273 = dma.done.wait [#allocation4], 256  }
 0x232   :  { %274 = vsyncadd [#allocation4], 4294967040 }
 0x233   :  { %217 = vsyncpa [#allocation4], 1 }

</bundles_post_ra>
